<compile_context>
chip_gen: v7x
topology: tpu7x:2x2x1
jax: 0.10.0
libtpu: 0.0.40
codegen_flags: <defaults>
</compile_context>

<pallas_src>
import functools

import jax
import jax.numpy as jnp
from jax.experimental import pallas as pl
from jax.experimental.pallas import tpu as pltpu

LANE = 128   # TPU lane width; feature dims are padded to this granule.
SUBLANE = 8  # sublane granule for the row (batch) tile.


def _round_up(n, m):
    return ((n + m - 1) // m) * m


def _fused_mlp_kernel(num_layers, x_ref, *refs):
    """refs = (w0, b0, w1, b1, ..., o_ref). Computes sigmoid(x @ W + b) chained.

    MXU matmuls use bf16 operands with f32 accumulation; bias-add is VPU and
    sigmoid's exp goes to the EUP, both in f32 (v5e has no bf16 VPU/EUP path).
    Intermediates stay in vregs/VMEM - no HBM traffic between layers - and the
    final store is full-lane (output width padded to 128).
    """
    o_ref = refs[-1]
    acc_lo = x_ref[...].astype(jnp.bfloat16)          # MXU-native operand dtype
    out_f32 = None
    for l in range(num_layers):
        w = refs[2 * l][...]                           # bf16 (in, out)
        b = refs[2 * l + 1][...]                       # f32  (1, out) -> broadcasts
        out_f32 = jnp.dot(acc_lo, w, preferred_element_type=jnp.float32) + b
        out_f32 = jax.nn.sigmoid(out_f32)              # f32 on VPU/EUP
        acc_lo = out_f32.astype(jnp.bfloat16)          # next layer's MXU operand
    o_ref[...] = out_f32.astype(o_ref.dtype)


def init_mlp_params(channel_lst, key):
    """nn.Linear-style init; weights stored transposed as (in, out) for x @ W.

    Returns (raw_params, padded_params, out_features):
      raw_params:    [(w (in, out) f32, b (out,) f32)]        - reference math
      padded_params: [(w_p (in_p, out_p) bf16, b_p (1, out_p) f32)] - kernel
                     operands, output feature dims zero-padded to LANE
                     multiples. Padding is inert: padded bias entries are 0
                     (=> padded activations are sigmoid(0)=0.5) and the next
                     layer's weight rows for those columns are 0.
    """
    raw, padded = [], []
    prev_out_pad = None
    for idx, (in_ch, out_ch) in enumerate(channel_lst):
        key, kw, kb = jax.random.split(key, 3)
        bound = 1.0 / float(in_ch) ** 0.5
        w = jax.random.uniform(kw, (in_ch, out_ch), jnp.float32, -bound, bound)
        b = jax.random.uniform(kb, (out_ch,), jnp.float32, -bound, bound)
        raw.append((w, b))

        in_pad = in_ch if idx == 0 else prev_out_pad
        out_pad = _round_up(out_ch, LANE)
        w_p = jnp.zeros((in_pad, out_pad), jnp.float32).at[:in_ch, :out_ch].set(w)
        b_p = jnp.zeros((1, out_pad), jnp.float32).at[:, :out_ch].set(b)
        padded.append((w_p.astype(jnp.bfloat16), b_p))   # bf16 weights for the MXU
        prev_out_pad = out_pad
    return raw, padded, channel_lst[-1][1]


def mlp_forward(x, padded_params, out_features, *, tile_b=256):
    """Runs the whole MLP in a single fused Pallas kernel with a parallel
    batch grid, then slices the row/lane padding back off."""
    B, in_feat = x.shape
    num_layers = len(padded_params)
    out_pad = padded_params[-1][0].shape[1]

    # Row tile: multiple of the 8-row sublane granule, capped at tile_b.
    tb = min(tile_b, _round_up(B, SUBLANE))
    b_pad = _round_up(B, tb)
    if b_pad != B:
        x = jnp.pad(x, ((0, b_pad - B), (0, 0)))
    grid = (b_pad // tb,)

    flat = []
    for w_p, b_p in padded_params:
        flat.extend((w_p, b_p))

    in_specs = [pl.BlockSpec((tb, in_feat), lambda i: (i, 0))]       # batched x
    for w_p, b_p in padded_params:
        # Whole-array blocks with a constant index_map: DMA'd once, then
        # VMEM-resident for every batch tile (no per-step re-DMA).
        in_specs.append(pl.BlockSpec(w_p.shape, lambda i: (0, 0)))
        in_specs.append(pl.BlockSpec(b_p.shape, lambda i: (0, 0)))
    out_spec = pl.BlockSpec((tb, out_pad), lambda i: (i, 0))

    # VMEM budget: resident params + double-buffered x/out tiles, with headroom,
    # capped below v7x's 64 MiB physical VMEM.
    param_bytes = sum(w.size * w.dtype.itemsize + b.size * b.dtype.itemsize
                      for w, b in padded_params)
    io_bytes = 2 * (tb * in_feat * 4 + tb * out_pad * 4)   # double-buffered tiles
    act_bytes = num_layers * tb * out_pad * 4               # in-kernel intermediates
    vmem_limit = int(min(64 * 1024 * 1024,
                         max(16 * 1024 * 1024,
                             4 * (param_bytes + io_bytes + act_bytes))))

    flops = 2 * b_pad * sum(w.shape[0] * w.shape[1] for w, _ in padded_params)
    transcendentals = b_pad * sum(w.shape[1] for w, _ in padded_params)
    bytes_accessed = (b_pad * in_feat * 4 + param_bytes + b_pad * out_pad * 4)

    out_padded = pl.pallas_call(
        functools.partial(_fused_mlp_kernel, num_layers),
        out_shape=jax.ShapeDtypeStruct((b_pad, out_pad), x.dtype),
        grid=grid,
        in_specs=in_specs,
        out_specs=out_spec,
        compiler_params=pltpu.CompilerParams(
            dimension_semantics=("parallel",),
            vmem_limit_bytes=vmem_limit),
        cost_estimate=pl.CostEstimate(
            flops=flops,
            transcendentals=transcendentals,
            bytes_accessed=bytes_accessed),
    )(x, *flat)

    # Single cheap slice back to the true (unpadded) batch / output width.
    return out_padded[:B, :out_features]


if __name__ == "__main__":
    key = jax.random.PRNGKey(0)
    channel_lst = [(32, 64), (64, 32), (32, 16)]

    kx, kp = jax.random.split(key)
    x = jax.random.normal(kx, (8, 32), jnp.float32)  # batch=8, in_features=32
    raw_params, padded_params, out_features = init_mlp_params(channel_lst, kp)

    out = mlp_forward(x, padded_params, out_features)
    out = jax.block_until_ready(out)

    # Reference in plain JAX on the UNPADDED f32 params (verifies padding is
    # inert). Tolerance relaxed because the kernel uses bf16 MXU operands.
    ref = x
    for (w, b) in raw_params:
        ref = jax.nn.sigmoid(ref @ w + b)

    assert out.shape == (8, 16)
    assert jnp.allclose(out, ref, atol=2e-2, rtol=2e-2)

    print("KERNEL_OK")
</pallas_src>

<mosaic_0001>
module attributes {stable_mosaic.version = 11 : i64} {
  func.func @_fused_mlp_kernel(%arg0: i32, %arg1: memref<8x32xf32, #tpu.memory_space<vmem>>, %arg2: memref<32x128xbf16, #tpu.memory_space<vmem>>, %arg3: memref<1x128xf32, #tpu.memory_space<vmem>>, %arg4: memref<128x128xbf16, #tpu.memory_space<vmem>>, %arg5: memref<1x128xf32, #tpu.memory_space<vmem>>, %arg6: memref<128x128xbf16, #tpu.memory_space<vmem>>, %arg7: memref<1x128xf32, #tpu.memory_space<vmem>>, %arg8: memref<8x128xf32, #tpu.memory_space<vmem>>) attributes {dimension_semantics = [#tpu.dimension_semantics<parallel>], iteration_bounds = array<i64: 1>, scalar_prefetch = 0 : i64, scratch_operands = 0 : i64, tpu.core_type = #tpu.core_type<tc>, window_params = [{transform_indices = @transform_0, window_bounds = array<i64: 8, 32>}, {pipeline_mode = #tpu.pipeline_mode<synchronous>, transform_indices = @transform_1, window_bounds = array<i64: 32, 128>}, {pipeline_mode = #tpu.pipeline_mode<synchronous>, transform_indices = @transform_2, window_bounds = array<i64: 1, 128>}, {pipeline_mode = #tpu.pipeline_mode<synchronous>, transform_indices = @transform_3, window_bounds = array<i64: 128, 128>}, {pipeline_mode = #tpu.pipeline_mode<synchronous>, transform_indices = @transform_4, window_bounds = array<i64: 1, 128>}, {pipeline_mode = #tpu.pipeline_mode<synchronous>, transform_indices = @transform_5, window_bounds = array<i64: 128, 128>}, {pipeline_mode = #tpu.pipeline_mode<synchronous>, transform_indices = @transform_6, window_bounds = array<i64: 1, 128>}, {transform_indices = @transform_7, window_bounds = array<i64: 8, 128>}]} {
    %c0 = arith.constant 0 : index
    %c0_0 = arith.constant 0 : index
    %0 = vector.load %arg1[%c0, %c0_0] : memref<8x32xf32, #tpu.memory_space<vmem>>, vector<8x32xf32>
    %1 = arith.truncf %0 : vector<8x32xf32> to vector<8x32xbf16>
    %c0_1 = arith.constant 0 : index
    %c0_2 = arith.constant 0 : index
    %2 = vector.load %arg2[%c0_1, %c0_2] : memref<32x128xbf16, #tpu.memory_space<vmem>>, vector<32x128xbf16>
    %c0_3 = arith.constant 0 : index
    %c0_4 = arith.constant 0 : index
    %3 = vector.load %arg3[%c0_3, %c0_4] : memref<1x128xf32, #tpu.memory_space<vmem>>, vector<1x128xf32>
    %cst = arith.constant dense<0.000000e+00> : vector<8x128xf32>
    %4 = tpu.matmul %1, %2, %cst {dimension_numbers = #tpu.dot_dimension_numbers<[1], [0], [0], [1], [0, 0, 1, 1], [], []>} : vector<8x32xbf16>, vector<32x128xbf16>, vector<8x128xf32> -> vector<8x128xf32>
    %5 = vector.broadcast %3 : vector<1x128xf32> to vector<8x128xf32>
    %6 = arith.addf %4, %5 : vector<8x128xf32>
    %7 = arith.negf %6 : vector<8x128xf32>
    %8 = math.exp %7 : vector<8x128xf32>
    %cst_5 = arith.constant 1.000000e+00 : f32
    %9 = vector.broadcast %cst_5 : f32 to vector<8x128xf32>
    %10 = arith.addf %9, %8 : vector<8x128xf32>
    %11 = arith.divf %9, %10 : vector<8x128xf32>
    %12 = arith.truncf %11 : vector<8x128xf32> to vector<8x128xbf16>
    %c0_6 = arith.constant 0 : index
    %c0_7 = arith.constant 0 : index
    %13 = vector.load %arg4[%c0_6, %c0_7] : memref<128x128xbf16, #tpu.memory_space<vmem>>, vector<128x128xbf16>
    %c0_8 = arith.constant 0 : index
    %c0_9 = arith.constant 0 : index
    %14 = vector.load %arg5[%c0_8, %c0_9] : memref<1x128xf32, #tpu.memory_space<vmem>>, vector<1x128xf32>
    %cst_10 = arith.constant dense<0.000000e+00> : vector<8x128xf32>
    %15 = tpu.matmul %12, %13, %cst_10 {dimension_numbers = #tpu.dot_dimension_numbers<[1], [0], [0], [1], [0, 0, 1, 1], [], []>} : vector<8x128xbf16>, vector<128x128xbf16>, vector<8x128xf32> -> vector<8x128xf32>
    %16 = vector.broadcast %14 : vector<1x128xf32> to vector<8x128xf32>
    %17 = arith.addf %15, %16 : vector<8x128xf32>
    %18 = arith.negf %17 : vector<8x128xf32>
    %19 = math.exp %18 : vector<8x128xf32>
    %cst_11 = arith.constant 1.000000e+00 : f32
    %20 = vector.broadcast %cst_11 : f32 to vector<8x128xf32>
    %21 = arith.addf %20, %19 : vector<8x128xf32>
    %22 = arith.divf %20, %21 : vector<8x128xf32>
    %23 = arith.truncf %22 : vector<8x128xf32> to vector<8x128xbf16>
    %c0_12 = arith.constant 0 : index
    %c0_13 = arith.constant 0 : index
    %24 = vector.load %arg6[%c0_12, %c0_13] : memref<128x128xbf16, #tpu.memory_space<vmem>>, vector<128x128xbf16>
    %c0_14 = arith.constant 0 : index
    %c0_15 = arith.constant 0 : index
    %25 = vector.load %arg7[%c0_14, %c0_15] : memref<1x128xf32, #tpu.memory_space<vmem>>, vector<1x128xf32>
    %cst_16 = arith.constant dense<0.000000e+00> : vector<8x128xf32>
    %26 = tpu.matmul %23, %24, %cst_16 {dimension_numbers = #tpu.dot_dimension_numbers<[1], [0], [0], [1], [0, 0, 1, 1], [], []>} : vector<8x128xbf16>, vector<128x128xbf16>, vector<8x128xf32> -> vector<8x128xf32>
    %27 = vector.broadcast %25 : vector<1x128xf32> to vector<8x128xf32>
    %28 = arith.addf %26, %27 : vector<8x128xf32>
    %29 = arith.negf %28 : vector<8x128xf32>
    %30 = math.exp %29 : vector<8x128xf32>
    %cst_17 = arith.constant 1.000000e+00 : f32
    %31 = vector.broadcast %cst_17 : f32 to vector<8x128xf32>
    %32 = arith.addf %31, %30 : vector<8x128xf32>
    %33 = arith.divf %31, %32 : vector<8x128xf32>
    %c0_18 = arith.constant 0 : index
    %c0_19 = arith.constant 0 : index
    %34 = vector.load %arg8[%c0_18, %c0_19] : memref<8x128xf32, #tpu.memory_space<vmem>>, vector<8x128xf32>
    tpu.vector_store %arg8[%c0_18, %c0_19], %33 {strides = array<i32>} : memref<8x128xf32, #tpu.memory_space<vmem>>, vector<8x128xf32>,
    return
  }
  func.func @transform_0(%arg0: i32) -> (i32, i32) {
    %c0_i32 = arith.constant 0 : i32
    %c0_i32_0 = arith.constant 0 : i32
    return %arg0, %c0_i32 : i32, i32
  }
  func.func @transform_1(%arg0: i32) -> (i32, i32) {
    %c0_i32 = arith.constant 0 : i32
    %c0_i32_0 = arith.constant 0 : i32
    %c0_i32_1 = arith.constant 0 : i32
    return %c0_i32, %c0_i32_0 : i32, i32
  }
  func.func @transform_2(%arg0: i32) -> (i32, i32) {
    %c0_i32 = arith.constant 0 : i32
    %c0_i32_0 = arith.constant 0 : i32
    %c0_i32_1 = arith.constant 0 : i32
    return %c0_i32, %c0_i32_0 : i32, i32
  }
  func.func @transform_3(%arg0: i32) -> (i32, i32) {
    %c0_i32 = arith.constant 0 : i32
    %c0_i32_0 = arith.constant 0 : i32
    %c0_i32_1 = arith.constant 0 : i32
    return %c0_i32, %c0_i32_0 : i32, i32
  }
  func.func @transform_4(%arg0: i32) -> (i32, i32) {
    %c0_i32 = arith.constant 0 : i32
    %c0_i32_0 = arith.constant 0 : i32
    %c0_i32_1 = arith.constant 0 : i32
    return %c0_i32, %c0_i32_0 : i32, i32
  }
  func.func @transform_5(%arg0: i32) -> (i32, i32) {
    %c0_i32 = arith.constant 0 : i32
    %c0_i32_0 = arith.constant 0 : i32
    %c0_i32_1 = arith.constant 0 : i32
    return %c0_i32, %c0_i32_0 : i32, i32
  }
  func.func @transform_6(%arg0: i32) -> (i32, i32) {
    %c0_i32 = arith.constant 0 : i32
    %c0_i32_0 = arith.constant 0 : i32
    %c0_i32_1 = arith.constant 0 : i32
    return %c0_i32, %c0_i32_0 : i32, i32
  }
  func.func @transform_7(%arg0: i32) -> (i32, i32) {
    %c0_i32 = arith.constant 0 : i32
    %c0_i32_0 = arith.constant 0 : i32
    return %arg0, %c0_i32 : i32, i32
  }
}

</mosaic_0001>

<bundles_post_ra>
// kernel: tpu_custom_call.1
= control target key start
LH: loop header
LB: loop body
LE: loop exit
PB: predicated region body
PF: predicated region fallthrough
CT: control target
= control target key end

     0   :  { %12 = vsyncpa [#allocation3], 0  ;;  %s809_s0 = inlined_call_operand.hbm [shape: f32[8,32], index: 0, kind: input, shape index: {}]   ;;  %s810_s1 = inlined_call_operand.hbm [shape: bf16[32,128], index: 1, kind: input, shape index: {}]   ;;  %s811_s2 = inlined_call_operand.vmem [shape: f32[1,128], index: 2, kind: input, shape index: {}]   ;;  %s812_s3 = inlined_call_operand.hbm [shape: bf16[128,128], index: 3, kind: input, shape index: {}]   ;;  %s813_s4 = inlined_call_operand.vmem [shape: f32[1,128], index: 4, kind: input, shape index: {}]   ;;  %s814_s5 = inlined_call_operand.hbm [shape: bf16[128,128], index: 5, kind: input, shape index: {}]   ;;  %s815_s6 = inlined_call_operand.vmem [shape: f32[1,128], index: 6, kind: input, shape index: {}]   ;;  %s816_s7 = inlined_call_operand.hbm [shape: f32[8,128], index: 7, kind: output, shape index: {}]  }
   0x1   :  { %13 = vsyncpa [#allocation6], 0 }
   0x2   :  { %14 = vsyncpa [#allocation9], 0 }
   0x3   :  { %15 = vsyncpa [#allocation4], 0  ;;  %s661_s24 = smov [#allocation5]   ;;  %s543_s28 = scalar_lea.hbm %s810_s1, 256 }
   0x4   :  { %s31_s25 = sshll.u32 %s661_s24, 4  ;;  %p544_p0 = scmp.ne.s32.totalorder %s810_s1, %s543_s28  ;;  %s32_s25 = int_to_ptr.vmem [resolvable:$true] %s31_s25 }
   0x5   :  { %p547_p1 = scmp.lt.u32.totalorder %s543_s28, %s810_s1 }
   0x7   :  { %p549_p2 = pnand %p547_p1, %p544_p0 }
   0x9   :  { %552 = shalt.err (!%p549_p2)
}
   0xa   :  { %s553_s10 = scalar_lea.vmem %s32_s25, 256  ;;  %p558_p4 = scmp.lt.s32.totalorder %s32_s25, %s32_s25 }
   0xb   :  { %p554_p3 = scmp.ne.s32.totalorder %s32_s25, %s553_s10  ;;  %p559_p5 = scmp.lt.s32.totalorder %s553_s10, %s553_s10 }
   0xd   :  { %p560_p6 = por %p559_p5, %p558_p4 }
   0xf   :  { %p561_p7 = pnand %p560_p6, %p554_p3 }
  0x11   :  { %564 = shalt.err (!%p561_p7)
}
  0x12   :  { %s662_s11 = smov 64   ;;  %s663_s12 = smov 4  }
  0x13   :  { %37 = dma.hbm_to_vmem [thread:$0]  %s810_s1, 256, %s32_s25, [#allocation6], %s662_s11, %s662_s11, %s663_s12  }
  0x14   :  { %s664_s15 = smov [#allocation2]   ;;  %s665_s17 = smov [#allocation7]  }
  0x15   :  { %s22_s16 = sshll.u32 %s664_s15, 4  ;;  %s45_s18 = sshll.u32 %s665_s17, 4  ;;  %s23_s16 = int_to_ptr.vmem [resolvable:$true] %s22_s16  ;;  %s46_s18 = int_to_ptr.vmem [resolvable:$true] %s45_s18 }
  0x16   :  { %s565_s21 = scalar_lea.hbm %s809_s0, 128 }
  0x17   :  { %p566_p8 = scmp.ne.s32.totalorder %s809_s0, %s565_s21  ;;  %p569_p9 = scmp.lt.u32.totalorder %s565_s21, %s809_s0 }
  0x19   :  { %p571_p10 = pnand %p569_p9, %p566_p8 }
  0x1b   :  { %574 = shalt.err (!%p571_p10)
}
  0x1c   :  { %s575_s1 = scalar_lea.vmem %s23_s16, 128  ;;  %p580_p12 = scmp.lt.s32.totalorder %s23_s16, %s23_s16 }
  0x1d   :  { %p576_p11 = scmp.ne.s32.totalorder %s23_s16, %s575_s1  ;;  %p581_p13 = scmp.lt.s32.totalorder %s575_s1, %s575_s1 }
  0x1f   :  { %p582_p0 = por %p581_p13, %p580_p12 }
  0x21   :  { %p583_p1 = pnand %p582_p0, %p576_p11 }
  0x23   :  { %586 = shalt.err (!%p583_p1)
}
  0x24   :  { %25 = dma.hbm_to_vmem [thread:$0]  %s809_s0, 128, %s23_s16, [#allocation3]  }
  0x25   :  { %s587_s30 = scalar_lea.hbm %s812_s3, 1024 }
  0x26   :  { %p588_p2 = scmp.ne.s32.totalorder %s812_s3, %s587_s30  ;;  %p591_p3 = scmp.lt.u32.totalorder %s587_s30, %s812_s3 }
  0x28   :  { %p593_p4 = pnand %p591_p3, %p588_p2 }
  0x2a   :  { %596 = shalt.err (!%p593_p4)
}
  0x2b   :  { %s597_s14 = scalar_lea.vmem %s46_s18, 1024  ;;  %p602_p6 = scmp.lt.s32.totalorder %s46_s18, %s46_s18 }
  0x2c   :  { %p598_p5 = scmp.ne.s32.totalorder %s46_s18, %s597_s14  ;;  %p603_p7 = scmp.lt.s32.totalorder %s597_s14, %s597_s14 }
  0x2e   :  { %p604_p8 = por %p603_p7, %p602_p6 }
  0x30   :  { %p605_p9 = pnand %p604_p8, %p598_p5 }
  0x32   :  { %608 = shalt.err (!%p605_p9)
}
  0x33   :  { %51 = dma.hbm_to_vmem [thread:$0]  %s812_s3, 1024, %s46_s18, [#allocation6], %s662_s11, %s662_s11, %s663_s12  }
  0x34   :  { %s666_s16 = smov [#allocation8]   ;;  %s609_s21 = scalar_lea.hbm %s814_s5, 1024 }
  0x35   :  { %s59_s17 = sshll.u32 %s666_s16, 4  ;;  %p610_p10 = scmp.ne.s32.totalorder %s814_s5, %s609_s21  ;;  %s60_s17 = int_to_ptr.vmem [resolvable:$true] %s59_s17 }
  0x36   :  { %p613_p11 = scmp.lt.u32.totalorder %s609_s21, %s814_s5 }
  0x38   :  { %p615_p12 = pnand %p613_p11, %p610_p10 }
  0x3a   :  { %618 = shalt.err (!%p615_p12)
}
  0x3b   :  { %s619_s1 = scalar_lea.vmem %s60_s17, 1024  ;;  %p624_p0 = scmp.lt.s32.totalorder %s60_s17, %s60_s17 }
  0x3c   :  { %p620_p13 = scmp.ne.s32.totalorder %s60_s17, %s619_s1  ;;  %p625_p1 = scmp.lt.s32.totalorder %s619_s1, %s619_s1 }
  0x3e   :  { %p626_p2 = por %p625_p1, %p624_p0 }
  0x40   :  { %p627_p3 = pnand %p626_p2, %p620_p13 }
  0x42   :  { %630 = shalt.err (!%p627_p3)
}
  0x43   :  { %65 = dma.hbm_to_vmem [thread:$0]  %s814_s5, 1024, %s60_s17, [#allocation9], %s662_s11, %s662_s11, %s663_s12  }
  0x44   :  { %653 = dma.done.wait [#allocation3], 128  }
  0x45   :  { %654 = vsyncadd [#allocation3], 4294967168 }
  0x46   :  { %655 = dma.done.wait [#allocation6], 1280  }
  0x47   :  { %656 = vsyncadd [#allocation6], 4294966016 }
  0x48   :  { %657 = dma.done.wait [#allocation9], 1024  }
  0x49   :  { %658 = vsyncadd [#allocation9], 4294966272  ;;  %v667_v0 = vmov 0.0   ;;  %vm668_vm0 = vmmov 0   ;;  %v513_v1 = vld [vmem:[#allocation5] sm:$0xff]   ;;  %v514_v2 = vld [vmem:[#allocation5 + $0x8] sm:$0xff]  }
  0x4a   :  { %456 = vmatprep.subr.bf16.mxu0 %v667_v0  ;;  %460 = vmatprep.mubr.msk.bf16.mxu0 %vm668_vm0, %v667_v0  ;;  %v81_v3 = vld [vmem:[#allocation2] sm:$0xff]  ;;  %vm106_vm1 = vcmask 261120   ;;  %v515_v5 = vld [vmem:[#allocation7] sm:$0xff]   ;;  %v517_v7 = vld [vmem:[#allocation7 + $0x10] sm:$0xff]  }
  0x4b   :  { %464 = vmatprep.subr.bf16.mxu1 %v667_v0  ;;  %480 = vmatprep.mubr.msk.bf16.mxu1 %vm668_vm0, %v667_v0  ;;  %v82_v4 = vpack.c.bf16 %v81_v3, %v81_v3  ;;  %v516_v6 = vld [vmem:[#allocation7 + $0x8] sm:$0xff]   ;;  %v518_v8 = vld [vmem:[#allocation7 + $0x18] sm:$0xff]   ;;  %v519_v9 = vld [vmem:[#allocation7 + $0x20] sm:$0xff]  }
  0x4c   :  { %457 = vmatpush3.bf16.msra.mxu0 %v513_v1  ;;  %465 = vmatpush3.bf16.msra.mxu1 %v515_v5  ;;  %v520_v10 = vld [vmem:[#allocation7 + $0x28] sm:$0xff]   ;;  %v521_v11 = vld [vmem:[#allocation7 + $0x30] sm:$0xff]   ;;  %v522_v12 = vld [vmem:[#allocation7 + $0x38] sm:$0xff]  }
  0x4d   :  { %458 = vmatprep.subr.bf16.mxu0 %v667_v0  ;;  %466 = vmatprep.subr.bf16.mxu1 %v667_v0  ;;  %v410_v13 = vld [vmem:[%s811_s2] ss:$0 sm:$0xff]  ;;  %v523_v24 = vld [vmem:[#allocation8] sm:$0xff]   ;;  %v525_v26 = vld [vmem:[#allocation8 + $0x10] sm:$0xff]  }
  0x4e   :  { %v524_v25 = vld [vmem:[#allocation8 + $0x8] sm:$0xff]   ;;  %v526_v27 = vld [vmem:[#allocation8 + $0x18] sm:$0xff]   ;;  %v527_v28 = vld [vmem:[#allocation8 + $0x20] sm:$0xff]  }
  0x4f   :  { %v528_v29 = vld [vmem:[#allocation8 + $0x28] sm:$0xff]   ;;  %v529_v30 = vld [vmem:[#allocation8 + $0x30] sm:$0xff]   ;;  %v530_v31 = vld [vmem:[#allocation8 + $0x38] sm:$0xff]  }
  0x50   :  { %459 = vmatpush3.bf16.msra.mxu0 %v514_v2  ;;  %467 = vmatpush3.bf16.msra.mxu1 %v516_v6  ;;  %v415_v32 = vld [vmem:[%s813_s4] ss:$0 sm:$0xff]  ;;  %s669_s4 = smov [#allocation10]  }
  0x51   :  { %484 = vmatprep.subr.bf16.mxu0 %v667_v0  ;;  %468 = vmatprep.subr.bf16.mxu1 %v667_v0  ;;  %v425_v43 = vld [vmem:[%s815_s6] ss:$0 sm:$0xff]  ;;  %s399_s28 = sshll.u32 %s669_s4, 4  ;;  %s400_s28 = int_to_ptr.vmem [resolvable:$true] %s399_s28 }
  0x52   :  { %s631_s29 = scalar_lea.vmem %s400_s28, 128  ;;  %p636_p5 = scmp.lt.s32.totalorder %s400_s28, %s400_s28 }
  0x53   :  { %461 = vmatmul.mubr.msk.bf16.vlgmr.msra.gmra.mrb[0].mxu0 %vm106_vm1, %v82_v4  ;;  %p632_p4 = scmp.ne.s32.totalorder %s400_s28, %s631_s29  ;;  %p637_p6 = scmp.lt.s32.totalorder %s631_s29, %s631_s29 }
  0x54   :  { %500 = vmatprep.mubr.msk.bf16.mxu0 %vm668_vm0, %v667_v0  ;;  %469 = vmatpush3.bf16.msra.mxu1 %v517_v7 }
  0x55   :  { %470 = vmatprep.subr.bf16.mxu1 %v667_v0  ;;  %485 = vmatpush3.bf16.msra.mxu0 %v523_v24  ;;  %p638_p7 = por %p637_p6, %p636_p5 }
  0x56   :  { %486 = vmatprep.subr.bf16.mxu0 %v667_v0 }
  0x57   :  { %p639_p8 = pnand %p638_p7, %p632_p4 }
  0x58   :  { %471 = vmatpush3.bf16.msra.mxu1 %v518_v8 }
  0x59   :  { %472 = vmatprep.subr.bf16.mxu1 %v667_v0  ;;  %487 = vmatpush3.bf16.msra.mxu0 %v524_v25 }
  0x5a   :  { %488 = vmatprep.subr.bf16.mxu0 %v667_v0 }
  0x5c   :  { %473 = vmatpush3.bf16.msra.mxu1 %v519_v9 }
  0x5d   :  { %474 = vmatprep.subr.bf16.mxu1 %v667_v0  ;;  %489 = vmatpush3.bf16.msra.mxu0 %v525_v26 }
  0x5e   :  { %490 = vmatprep.subr.bf16.mxu0 %v667_v0 }
  0x60   :  { %475 = vmatpush3.bf16.msra.mxu1 %v520_v10 }
  0x61   :  { %476 = vmatprep.subr.bf16.mxu1 %v667_v0  ;;  %491 = vmatpush3.bf16.msra.mxu0 %v526_v27 }
  0x62   :  { %492 = vmatprep.subr.bf16.mxu0 %v667_v0 }
  0x64   :  { %477 = vmatpush3.bf16.msra.mxu1 %v521_v11 }
  0x65   :  { %478 = vmatprep.subr.bf16.mxu1 %v667_v0  ;;  %493 = vmatpush3.bf16.msra.mxu0 %v527_v28 }
  0x66   :  { %494 = vmatprep.subr.bf16.mxu0 %v667_v0 }
  0x68   :  { %479 = vmatpush3.bf16.msra.mxu1 %v522_v12 }
  0x69   :  { %495 = vmatpush3.bf16.msra.mxu0 %v528_v29 }
  0x6a   :  { %496 = vmatprep.subr.bf16.mxu0 %v667_v0 }
  0x6d   :  { %497 = vmatpush3.bf16.msra.mxu0 %v529_v30 }
  0x6e   :  { %498 = vmatprep.subr.bf16.mxu0 %v667_v0 }
  0x71   :  { %499 = vmatpush3.bf16.msra.mxu0 %v530_v31 }
 0x126   :  { %v144_v14 = vpop.f32.mrb[0].mxu0 }
 0x127   :  { %v145_v15 = vadd.f32 %v410_v13, %v144_v14  ;;  %v462_v16 = vpop.f32.mrb[1].mxu0 }
 0x128   :  { %v147_v17 = vpop.f32.mrb[2].mxu0 }
 0x129   :  { %v414_v18 = vmul.f32 -1.442695, %v145_v15  ;;  %v463_v19 = vpop.f32.mrb[3].mxu0 }
 0x12b   :  { %531 = vpow2.f32 %v414_v18 }
 0x135   :  { %v532_v20 = vpop.eup %531 }
 0x136   :  { %v153_v21 = vadd.f32 1.0, %v532_v20 }
 0x138   :  { %533 = vrcp.f32 %v153_v21 }
 0x142   :  { %v534_v22 = vpop.eup %533 }
 0x143   :  { %v156_v23 = vpack.c.bf16 %v534_v22, %v534_v22 }
 0x145   :  { %481 = vmatmul.mubr.bf16.vlgmr.msra.gmra.mrb[0].mxu1 %v156_v23 }
 0x218   :  { %v262_v33 = vpop.f32.mrb[0].mxu1 }
 0x219   :  { %v263_v34 = vadd.f32 %v415_v32, %v262_v33  ;;  %v482_v35 = vpop.f32.mrb[1].mxu1 }
 0x21a   :  { %v265_v36 = vpop.f32.mrb[2].mxu1 }
 0x21b   :  { %v424_v37 = vmul.f32 -1.442695, %v263_v34  ;;  %v483_v38 = vpop.f32.mrb[3].mxu1 }
 0x21d   :  { %535 = vpow2.f32 %v424_v37 }
 0x227   :  { %v536_v39 = vpop.eup %535 }
 0x228   :  { %v271_v40 = vadd.f32 1.0, %v536_v39 }
 0x22a   :  { %537 = vrcp.f32 %v271_v40 }
 0x234   :  { %v538_v41 = vpop.eup %537 }
 0x235   :  { %v274_v42 = vpack.c.bf16 %v538_v41, %v538_v41 }
 0x237   :  { %501 = vmatmul.mubr.bf16.vlgmr.msra.gmra.mrb[4].mxu0 %v274_v42 }
 0x30a   :  { %v380_v44 = vpop.f32.mrb[4].mxu0 }
 0x30b   :  { %v381_v45 = vadd.f32 %v425_v43, %v380_v44  ;;  %v502_v46 = vpop.f32.mrb[5].mxu0 }
 0x30c   :  { %v383_v47 = vpop.f32.mrb[6].mxu0 }
 0x30d   :  { %v434_v48 = vmul.f32 -1.442695, %v381_v45  ;;  %v503_v49 = vpop.f32.mrb[7].mxu0 }
 0x30f   :  { %539 = vpow2.f32 %v434_v48 }
 0x319   :  { %v540_v50 = vpop.eup %539 }
 0x31a   :  { %v389_v51 = vadd.f32 1.0, %v540_v50 }
 0x31c   :  { %541 = vrcp.f32 %v389_v51 }
 0x326   :  { %v542_v52 = vpop.eup %541 }
 0x327   :  { %392 = vst [vmem:[#allocation10] sm:$0xff] %v542_v52 }
 0x328   :  { %642 = shalt.err (!%p639_p8)
}
 0x329   :  { %s643_s8 = scalar_lea.hbm %s816_s7, 128 }
 0x32a   :  { %p644_p9 = scmp.ne.s32.totalorder %s816_s7, %s643_s8  ;;  %p647_p10 = scmp.lt.u32.totalorder %s643_s8, %s816_s7 }
 0x32c   :  { %p649_p11 = pnand %p647_p10, %p644_p9 }
 0x32e   :  { %652 = shalt.err (!%p649_p11)
}
 0x32f   :  { %402 = dma.vmem_to_hbm [thread:$0]  %s400_s28, 128, %s816_s7, [#allocation4]  }
 0x330   :  { %659 = dma.done.wait [#allocation4], 128  }
 0x331   :  { %660 = vsyncadd [#allocation4], 4294967168 }
 0x332   :  { %406 = vsyncpa [#allocation3], 1 }
 0x333   :  { %407 = vsyncpa [#allocation6], 1 }
 0x334   :  { %408 = vsyncpa [#allocation9], 1 }
 0x335   :  { %409 = vsyncpa [#allocation4], 1 }

</bundles_post_ra>
